<compile_context>
chip_gen: v7x
topology: tpu7x:2x2x1
jax: 0.10.0
libtpu: 0.0.40
codegen_flags: <defaults>
</compile_context>

<pallas_src>
import functools

import jax
import jax.numpy as jnp
from jax.experimental import pallas as pl
from jax.experimental.pallas import tpu as pltpu

N_RATIOS = 3
N_SCALES = 3
N_ANCHORS = N_RATIOS * N_SCALES      # 9
C_LOGITS = 2 * N_ANCHORS             # 18
C_DELTAS = 4 * N_ANCHORS             # 36
C_FUSED = 64                         # 18 + 36 = 54, zero-padded to 64 lanes


def rpn_kernel(x_ref, w1_ref, b1_ref, wf_ref, bf_ref, out_ref, *, tile_h, width):
    """One (batch, H-tile) step of the RPN head.

    x_ref:   (H+2, W+2, Cin)   zero-padded NHWC feature map (bf16), full map
    w1_ref:  (9, Cin, Cin)     3x3 conv weight, tap-major (dy*3+dx), bf16
    b1_ref:  (1, Cin)          f32
    wf_ref:  (Cin, 64)         fused 1x1 weight [logits | deltas | 0-pad], bf16
    bf_ref:  (1, 64)           f32
    out_ref: (tile_h*W, 64)    fused output rows for this H tile, f32
    """
    TH, W = tile_h, width
    C = w1_ref.shape[1]

    # Row window (with 1-row halo on each side) for this H tile.
    row0 = pl.multiple_of(pl.program_id(1) * TH, TH)
    x = x_ref[pl.ds(row0, TH + 2), :, :]        # (TH+2, W+2, C), bf16
    w1 = w1_ref[...]                            # hoisted: loaded once per step

    # 3x3 "same" conv as 9 MXU matmuls accumulated in f32.
    # Only 3 W-shifted views are materialized (one per dx); the dy shifts are
    # aligned row slices of the flattened view (free).
    acc = jnp.zeros((TH * W, C), jnp.float32)
    for dx in range(3):
        xs = x[:, dx:dx + W, :].reshape((TH + 2) * W, C)      # bf16 view, 1 copy
        for dy in range(3):
            acc = acc + jnp.dot(xs[dy * W:dy * W + TH * W, :],
                                w1[dy * 3 + dx],
                                preferred_element_type=jnp.float32)

    feat = jnp.maximum(acc + b1_ref[...], 0.0)                # f32 ReLU

    # Fused 1x1 heads: one (TH*W, C) @ (C, 64) matmul, lane-dense store.
    fused = jnp.dot(feat.astype(wf_ref.dtype), wf_ref[...],
                    preferred_element_type=jnp.float32) + bf_ref[...]
    out_ref[...] = fused.astype(out_ref.dtype)


def init_rpn_params(key, in_channel):
    """Deterministic init mirroring RPNHead.weight_init (normal std=0.01, bias 0)."""
    k1, k2, k3 = jax.random.split(key, 3)
    w1 = 0.01 * jax.random.normal(k1, (3, 3, in_channel, in_channel), jnp.float32)
    b1 = jnp.zeros((1, in_channel), jnp.float32)
    wl = 0.01 * jax.random.normal(k2, (in_channel, C_LOGITS), jnp.float32)
    bl = jnp.zeros((1, C_LOGITS), jnp.float32)
    wd = 0.01 * jax.random.normal(k3, (in_channel, C_DELTAS), jnp.float32)
    bd = jnp.zeros((1, C_DELTAS), jnp.float32)
    return dict(w1=w1, b1=b1, wl=wl, bl=bl, wd=wd, bd=bd)


def rpn_forward(features_nchw, params, *, tile_h=8, compute_dtype=jnp.bfloat16):
    """features_nchw: (B, C, H, W) f32 -> (logits (B, H*W*A, 2), deltas (B, H*W*A, 4))."""
    B, C, H, W = features_nchw.shape
    A = N_ANCHORS

    TH = tile_h if (H % tile_h == 0) else H     # H tile (must divide H)

    # NCHW -> NHWC, 1-px halo pad, bf16 cast: fused by XLA into one HBM pass.
    x = jnp.transpose(features_nchw, (0, 2, 3, 1))
    x_pad = jnp.pad(x, ((0, 0), (1, 1), (1, 1), (0, 0))).astype(compute_dtype)

    # Pack weights: 3x3 conv tap-major; fuse + zero-pad the two 1x1 heads.
    w1 = params["w1"].reshape(9, C, C).astype(compute_dtype)
    b1 = params["b1"].reshape(1, C).astype(jnp.float32)
    wf = jnp.concatenate([params["wl"], params["wd"]], axis=1)          # (C, 54)
    wf = jnp.pad(wf, ((0, 0), (0, C_FUSED - wf.shape[1]))).astype(compute_dtype)
    bf = jnp.concatenate([params["bl"], params["bd"]], axis=1)
    bf = jnp.pad(bf, ((0, 0), (0, C_FUSED - bf.shape[1]))).astype(jnp.float32)

    kernel = functools.partial(rpn_kernel, tile_h=TH, width=W)

    fused = pl.pallas_call(
        kernel,
        out_shape=jax.ShapeDtypeStruct((B, H * W, C_FUSED), jnp.float32),
        grid=(B, H // TH),
        in_specs=[
            # Full padded map per batch element; constant index across the H
            # axis so it is only DMA'd when `b` changes.
            pl.BlockSpec((None, H + 2, W + 2, C), lambda b, h: (b, 0, 0, 0)),
            pl.BlockSpec((9, C, C), lambda b, h: (0, 0, 0)),
            pl.BlockSpec((1, C), lambda b, h: (0, 0)),
            pl.BlockSpec((C, C_FUSED), lambda b, h: (0, 0)),
            pl.BlockSpec((1, C_FUSED), lambda b, h: (0, 0)),
        ],
        out_specs=pl.BlockSpec((None, TH * W, C_FUSED), lambda b, h: (b, h, 0)),
        compiler_params=pltpu.CompilerParams(
            dimension_semantics=("parallel", "parallel")),
    )(x_pad, w1, b1, wf, bf)

    # NHWC output => PyTorch's permute(0,2,3,1).reshape(...) is a plain reshape.
    logits = fused[:, :, :C_LOGITS].reshape(B, H * W * A, 2)
    deltas = fused[:, :, C_LOGITS:C_LOGITS + C_DELTAS].reshape(B, H * W * A, 4)
    return logits, deltas


def rpn_forward_ref(features_nchw, params, *, compute_dtype=jnp.bfloat16):
    """Pure-JAX reference (lax.conv) using the same bf16-operand / f32-accum recipe."""
    B, C, H, W = features_nchw.shape
    x = jnp.transpose(features_nchw, (0, 2, 3, 1)).astype(compute_dtype)
    w1 = params["w1"].astype(compute_dtype)
    dn = jax.lax.conv_dimension_numbers(x.shape, w1.shape, ("NHWC", "HWIO", "NHWC"))
    feat = jax.lax.conv_general_dilated(x, w1, (1, 1), "SAME", dimension_numbers=dn,
                                        preferred_element_type=jnp.float32)
    feat = jnp.maximum(feat + params["b1"].reshape(1, 1, 1, -1), 0.0)
    feat = feat.astype(compute_dtype)
    logits = jnp.einsum("bhwc,cn->bhwn", feat, params["wl"].astype(compute_dtype),
                        preferred_element_type=jnp.float32) + params["bl"].reshape(1, 1, 1, -1)
    deltas = jnp.einsum("bhwc,cn->bhwn", feat, params["wd"].astype(compute_dtype),
                        preferred_element_type=jnp.float32) + params["bd"].reshape(1, 1, 1, -1)
    return (logits.reshape(B, H * W * N_ANCHORS, 2),
            deltas.reshape(B, H * W * N_ANCHORS, 4))


if __name__ == "__main__":
    # TODO(synk): AnchorGenerator outputs (multi_scale_anchors) are not used in
    # RPN.forward(), so they are not reproduced here.
    B, C, H, W = 2, 4, 16, 16
    key = jax.random.PRNGKey(0)
    k_x, k_p = jax.random.split(key)
    features = jax.random.normal(k_x, (B, C, H, W), jnp.float32)
    params = init_rpn_params(k_p, C)

    logits, deltas = jax.jit(rpn_forward)(features, params)
    jax.block_until_ready((logits, deltas))

    ref_logits, ref_deltas = rpn_forward_ref(features, params)
    assert logits.shape == (B, H * W * N_ANCHORS, 2)
    assert deltas.shape == (B, H * W * N_ANCHORS, 4)
    assert jnp.allclose(logits, ref_logits, rtol=1e-3, atol=1e-5), \
        float(jnp.max(jnp.abs(logits - ref_logits)))
    assert jnp.allclose(deltas, ref_deltas, rtol=1e-3, atol=1e-5), \
        float(jnp.max(jnp.abs(deltas - ref_deltas)))

    print("KERNEL_OK")
</pallas_src>

<mosaic_0001>
module attributes {stable_mosaic.version = 11 : i64} {
  func.func @rpn_kernel(%arg0: i32, %arg1: i32, %arg2: memref<1x18x18x4xbf16, #tpu.memory_space<vmem>>, %arg3: memref<9x4x4xbf16, #tpu.memory_space<vmem>>, %arg4: memref<1x4xf32, #tpu.memory_space<vmem>>, %arg5: memref<4x64xbf16, #tpu.memory_space<vmem>>, %arg6: memref<1x64xf32, #tpu.memory_space<vmem>>, %arg7: memref<1x128x64xf32, #tpu.memory_space<vmem>>) attributes {dimension_semantics = [#tpu.dimension_semantics<parallel>, #tpu.dimension_semantics<parallel>], iteration_bounds = array<i64: 2, 2>, scalar_prefetch = 0 : i64, scratch_operands = 0 : i64, tpu.core_type = #tpu.core_type<tc>, window_params = [{transform_indices = @transform_0, window_bounds = array<i64: 1, 18, 18, 4>}, {pipeline_mode = #tpu.pipeline_mode<synchronous>, transform_indices = @transform_1, window_bounds = array<i64: 9, 4, 4>}, {pipeline_mode = #tpu.pipeline_mode<synchronous>, transform_indices = @transform_2, window_bounds = array<i64: 1, 4>}, {pipeline_mode = #tpu.pipeline_mode<synchronous>, transform_indices = @transform_3, window_bounds = array<i64: 4, 64>}, {pipeline_mode = #tpu.pipeline_mode<synchronous>, transform_indices = @transform_4, window_bounds = array<i64: 1, 64>}, {transform_indices = @transform_5, window_bounds = array<i64: 1, 128, 64>}]} {
    %c8_i32 = arith.constant 8 : i32
    %0 = arith.muli %arg1, %c8_i32 : i32
    %1 = tpu.assume_multiple %0, 8 : i32
    %c0 = arith.constant 0 : index
    %2 = arith.index_cast %1 : i32 to index
    %c0_0 = arith.constant 0 : index
    %c0_1 = arith.constant 0 : index
    %3 = vector.load %arg2[%c0, %2, %c0_0, %c0_1] : memref<1x18x18x4xbf16, #tpu.memory_space<vmem>>, vector<1x10x18x4xbf16>
    %4 = vector.shape_cast %3 : vector<1x10x18x4xbf16> to vector<10x18x4xbf16>
    %c0_2 = arith.constant 0 : index
    %c0_3 = arith.constant 0 : index
    %c0_4 = arith.constant 0 : index
    %5 = vector.load %arg3[%c0_2, %c0_3, %c0_4] : memref<9x4x4xbf16, #tpu.memory_space<vmem>>, vector<9x4x4xbf16>
    %cst = arith.constant 0.000000e+00 : f32
    %6 = vector.broadcast %cst : f32 to vector<128x4xf32>
    %7 = vector.extract_strided_slice %4 {offsets = [0, 0, 0], sizes = [10, 16, 4], strides = [1, 1, 1]} : vector<10x18x4xbf16> to vector<10x16x4xbf16>
    %8 = vector.shape_cast %7 : vector<10x16x4xbf16> to vector<160x4xbf16>
    %9 = vector.extract_strided_slice %8 {offsets = [0, 0], sizes = [128, 4], strides = [1, 1]} : vector<160x4xbf16> to vector<128x4xbf16>
    %10 = vector.extract_strided_slice %5 {offsets = [0, 0, 0], sizes = [1, 4, 4], strides = [1, 1, 1]} : vector<9x4x4xbf16> to vector<1x4x4xbf16>
    %11 = vector.shape_cast %10 : vector<1x4x4xbf16> to vector<4x4xbf16>
    %cst_5 = arith.constant dense<0.000000e+00> : vector<128x4xf32>
    %12 = tpu.matmul %9, %11, %cst_5 {dimension_numbers = #tpu.dot_dimension_numbers<[1], [0], [0], [1], [0, 0, 1, 1], [], []>} : vector<128x4xbf16>, vector<4x4xbf16>, vector<128x4xf32> -> vector<128x4xf32>
    %13 = arith.addf %6, %12 : vector<128x4xf32>
    %14 = vector.extract_strided_slice %8 {offsets = [16, 0], sizes = [128, 4], strides = [1, 1]} : vector<160x4xbf16> to vector<128x4xbf16>
    %15 = vector.extract_strided_slice %5 {offsets = [3, 0, 0], sizes = [1, 4, 4], strides = [1, 1, 1]} : vector<9x4x4xbf16> to vector<1x4x4xbf16>
    %16 = vector.shape_cast %15 : vector<1x4x4xbf16> to vector<4x4xbf16>
    %cst_6 = arith.constant dense<0.000000e+00> : vector<128x4xf32>
    %17 = tpu.matmul %14, %16, %cst_6 {dimension_numbers = #tpu.dot_dimension_numbers<[1], [0], [0], [1], [0, 0, 1, 1], [], []>} : vector<128x4xbf16>, vector<4x4xbf16>, vector<128x4xf32> -> vector<128x4xf32>
    %18 = arith.addf %13, %17 : vector<128x4xf32>
    %19 = vector.extract_strided_slice %8 {offsets = [32, 0], sizes = [128, 4], strides = [1, 1]} : vector<160x4xbf16> to vector<128x4xbf16>
    %20 = vector.extract_strided_slice %5 {offsets = [6, 0, 0], sizes = [1, 4, 4], strides = [1, 1, 1]} : vector<9x4x4xbf16> to vector<1x4x4xbf16>
    %21 = vector.shape_cast %20 : vector<1x4x4xbf16> to vector<4x4xbf16>
    %cst_7 = arith.constant dense<0.000000e+00> : vector<128x4xf32>
    %22 = tpu.matmul %19, %21, %cst_7 {dimension_numbers = #tpu.dot_dimension_numbers<[1], [0], [0], [1], [0, 0, 1, 1], [], []>} : vector<128x4xbf16>, vector<4x4xbf16>, vector<128x4xf32> -> vector<128x4xf32>
    %23 = arith.addf %18, %22 : vector<128x4xf32>
    %24 = vector.extract_strided_slice %4 {offsets = [0, 1, 0], sizes = [10, 16, 4], strides = [1, 1, 1]} : vector<10x18x4xbf16> to vector<10x16x4xbf16>
    %25 = vector.shape_cast %24 : vector<10x16x4xbf16> to vector<160x4xbf16>
    %26 = vector.extract_strided_slice %25 {offsets = [0, 0], sizes = [128, 4], strides = [1, 1]} : vector<160x4xbf16> to vector<128x4xbf16>
    %27 = vector.extract_strided_slice %5 {offsets = [1, 0, 0], sizes = [1, 4, 4], strides = [1, 1, 1]} : vector<9x4x4xbf16> to vector<1x4x4xbf16>
    %28 = vector.shape_cast %27 : vector<1x4x4xbf16> to vector<4x4xbf16>
    %cst_8 = arith.constant dense<0.000000e+00> : vector<128x4xf32>
    %29 = tpu.matmul %26, %28, %cst_8 {dimension_numbers = #tpu.dot_dimension_numbers<[1], [0], [0], [1], [0, 0, 1, 1], [], []>} : vector<128x4xbf16>, vector<4x4xbf16>, vector<128x4xf32> -> vector<128x4xf32>
    %30 = arith.addf %23, %29 : vector<128x4xf32>
    %31 = vector.extract_strided_slice %25 {offsets = [16, 0], sizes = [128, 4], strides = [1, 1]} : vector<160x4xbf16> to vector<128x4xbf16>
    %32 = vector.extract_strided_slice %5 {offsets = [4, 0, 0], sizes = [1, 4, 4], strides = [1, 1, 1]} : vector<9x4x4xbf16> to vector<1x4x4xbf16>
    %33 = vector.shape_cast %32 : vector<1x4x4xbf16> to vector<4x4xbf16>
    %cst_9 = arith.constant dense<0.000000e+00> : vector<128x4xf32>
    %34 = tpu.matmul %31, %33, %cst_9 {dimension_numbers = #tpu.dot_dimension_numbers<[1], [0], [0], [1], [0, 0, 1, 1], [], []>} : vector<128x4xbf16>, vector<4x4xbf16>, vector<128x4xf32> -> vector<128x4xf32>
    %35 = arith.addf %30, %34 : vector<128x4xf32>
    %36 = vector.extract_strided_slice %25 {offsets = [32, 0], sizes = [128, 4], strides = [1, 1]} : vector<160x4xbf16> to vector<128x4xbf16>
    %37 = vector.extract_strided_slice %5 {offsets = [7, 0, 0], sizes = [1, 4, 4], strides = [1, 1, 1]} : vector<9x4x4xbf16> to vector<1x4x4xbf16>
    %38 = vector.shape_cast %37 : vector<1x4x4xbf16> to vector<4x4xbf16>
    %cst_10 = arith.constant dense<0.000000e+00> : vector<128x4xf32>
    %39 = tpu.matmul %36, %38, %cst_10 {dimension_numbers = #tpu.dot_dimension_numbers<[1], [0], [0], [1], [0, 0, 1, 1], [], []>} : vector<128x4xbf16>, vector<4x4xbf16>, vector<128x4xf32> -> vector<128x4xf32>
    %40 = arith.addf %35, %39 : vector<128x4xf32>
    %41 = vector.extract_strided_slice %4 {offsets = [0, 2, 0], sizes = [10, 16, 4], strides = [1, 1, 1]} : vector<10x18x4xbf16> to vector<10x16x4xbf16>
    %42 = vector.shape_cast %41 : vector<10x16x4xbf16> to vector<160x4xbf16>
    %43 = vector.extract_strided_slice %42 {offsets = [0, 0], sizes = [128, 4], strides = [1, 1]} : vector<160x4xbf16> to vector<128x4xbf16>
    %44 = vector.extract_strided_slice %5 {offsets = [2, 0, 0], sizes = [1, 4, 4], strides = [1, 1, 1]} : vector<9x4x4xbf16> to vector<1x4x4xbf16>
    %45 = vector.shape_cast %44 : vector<1x4x4xbf16> to vector<4x4xbf16>
    %cst_11 = arith.constant dense<0.000000e+00> : vector<128x4xf32>
    %46 = tpu.matmul %43, %45, %cst_11 {dimension_numbers = #tpu.dot_dimension_numbers<[1], [0], [0], [1], [0, 0, 1, 1], [], []>} : vector<128x4xbf16>, vector<4x4xbf16>, vector<128x4xf32> -> vector<128x4xf32>
    %47 = arith.addf %40, %46 : vector<128x4xf32>
    %48 = vector.extract_strided_slice %42 {offsets = [16, 0], sizes = [128, 4], strides = [1, 1]} : vector<160x4xbf16> to vector<128x4xbf16>
    %49 = vector.extract_strided_slice %5 {offsets = [5, 0, 0], sizes = [1, 4, 4], strides = [1, 1, 1]} : vector<9x4x4xbf16> to vector<1x4x4xbf16>
    %50 = vector.shape_cast %49 : vector<1x4x4xbf16> to vector<4x4xbf16>
    %cst_12 = arith.constant dense<0.000000e+00> : vector<128x4xf32>
    %51 = tpu.matmul %48, %50, %cst_12 {dimension_numbers = #tpu.dot_dimension_numbers<[1], [0], [0], [1], [0, 0, 1, 1], [], []>} : vector<128x4xbf16>, vector<4x4xbf16>, vector<128x4xf32> -> vector<128x4xf32>
    %52 = arith.addf %47, %51 : vector<128x4xf32>
    %53 = vector.extract_strided_slice %42 {offsets = [32, 0], sizes = [128, 4], strides = [1, 1]} : vector<160x4xbf16> to vector<128x4xbf16>
    %54 = vector.extract_strided_slice %5 {offsets = [8, 0, 0], sizes = [1, 4, 4], strides = [1, 1, 1]} : vector<9x4x4xbf16> to vector<1x4x4xbf16>
    %55 = vector.shape_cast %54 : vector<1x4x4xbf16> to vector<4x4xbf16>
    %cst_13 = arith.constant dense<0.000000e+00> : vector<128x4xf32>
    %56 = tpu.matmul %53, %55, %cst_13 {dimension_numbers = #tpu.dot_dimension_numbers<[1], [0], [0], [1], [0, 0, 1, 1], [], []>} : vector<128x4xbf16>, vector<4x4xbf16>, vector<128x4xf32> -> vector<128x4xf32>
    %57 = arith.addf %52, %56 : vector<128x4xf32>
    %c0_14 = arith.constant 0 : index
    %c0_15 = arith.constant 0 : index
    %58 = vector.load %arg4[%c0_14, %c0_15] : memref<1x4xf32, #tpu.memory_space<vmem>>, vector<1x4xf32>
    %59 = vector.broadcast %58 : vector<1x4xf32> to vector<128x4xf32>
    %60 = arith.addf %57, %59 : vector<128x4xf32>
    %cst_16 = arith.constant 0.000000e+00 : f32
    %61 = vector.broadcast %cst_16 : f32 to vector<128x4xf32>
    %62 = arith.maximumf %60, %61 : vector<128x4xf32>
    %63 = arith.truncf %62 : vector<128x4xf32> to vector<128x4xbf16>
    %c0_17 = arith.constant 0 : index
    %c0_18 = arith.constant 0 : index
    %64 = vector.load %arg5[%c0_17, %c0_18] : memref<4x64xbf16, #tpu.memory_space<vmem>>, vector<4x64xbf16>
    %cst_19 = arith.constant dense<0.000000e+00> : vector<128x64xf32>
    %65 = tpu.matmul %63, %64, %cst_19 {dimension_numbers = #tpu.dot_dimension_numbers<[1], [0], [0], [1], [0, 0, 1, 1], [], []>} : vector<128x4xbf16>, vector<4x64xbf16>, vector<128x64xf32> -> vector<128x64xf32>
    %c0_20 = arith.constant 0 : index
    %c0_21 = arith.constant 0 : index
    %66 = vector.load %arg6[%c0_20, %c0_21] : memref<1x64xf32, #tpu.memory_space<vmem>>, vector<1x64xf32>
    %67 = vector.broadcast %66 : vector<1x64xf32> to vector<128x64xf32>
    %68 = arith.addf %65, %67 : vector<128x64xf32>
    %c0_22 = arith.constant 0 : index
    %c0_23 = arith.constant 0 : index
    %c0_24 = arith.constant 0 : index
    %69 = vector.load %arg7[%c0_22, %c0_23, %c0_24] : memref<1x128x64xf32, #tpu.memory_space<vmem>>, vector<1x128x64xf32>
    %70 = vector.shape_cast %69 : vector<1x128x64xf32> to vector<128x64xf32>
    %71 = vector.shape_cast %68 : vector<128x64xf32> to vector<1x128x64xf32>
    tpu.vector_store %arg7[%c0_22, %c0_23, %c0_24], %71 {strides = array<i32>} : memref<1x128x64xf32, #tpu.memory_space<vmem>>, vector<1x128x64xf32>,
    return
  }
  func.func @transform_0(%arg0: i32, %arg1: i32) -> (i32, i32, i32, i32) {
    %c0_i32 = arith.constant 0 : i32
    %c0_i32_0 = arith.constant 0 : i32
    %c0_i32_1 = arith.constant 0 : i32
    %c0_i32_2 = arith.constant 0 : i32
    return %arg0, %c0_i32, %c0_i32_0, %c0_i32_1 : i32, i32, i32, i32
  }
  func.func @transform_1(%arg0: i32, %arg1: i32) -> (i32, i32, i32) {
    %c0_i32 = arith.constant 0 : i32
    %c0_i32_0 = arith.constant 0 : i32
    %c0_i32_1 = arith.constant 0 : i32
    %c0_i32_2 = arith.constant 0 : i32
    return %c0_i32, %c0_i32_0, %c0_i32_1 : i32, i32, i32
  }
  func.func @transform_2(%arg0: i32, %arg1: i32) -> (i32, i32) {
    %c0_i32 = arith.constant 0 : i32
    %c0_i32_0 = arith.constant 0 : i32
    %c0_i32_1 = arith.constant 0 : i32
    return %c0_i32, %c0_i32_0 : i32, i32
  }
  func.func @transform_3(%arg0: i32, %arg1: i32) -> (i32, i32) {
    %c0_i32 = arith.constant 0 : i32
    %c0_i32_0 = arith.constant 0 : i32
    %c0_i32_1 = arith.constant 0 : i32
    return %c0_i32, %c0_i32_0 : i32, i32
  }
  func.func @transform_4(%arg0: i32, %arg1: i32) -> (i32, i32) {
    %c0_i32 = arith.constant 0 : i32
    %c0_i32_0 = arith.constant 0 : i32
    %c0_i32_1 = arith.constant 0 : i32
    return %c0_i32, %c0_i32_0 : i32, i32
  }
  func.func @transform_5(%arg0: i32, %arg1: i32) -> (i32, i32, i32) {
    %c0_i32 = arith.constant 0 : i32
    %c0_i32_0 = arith.constant 0 : i32
    return %arg0, %arg1, %c0_i32 : i32, i32, i32
  }
}

</mosaic_0001>

<bundles_post_ra>
// kernel: rpn_forward.1
= control target key start
LH: loop header
LB: loop body
LE: loop exit
PB: predicated region body
PF: predicated region fallthrough
CT: control target
= control target key end

     0   :  { %10 = vsyncpa [#allocation3], 0  ;;  %s2851_s18 = smov 0   ;;  %s2853_s19 = smov 0   ;;  %s3573_s0 = inlined_call_operand.vmem [shape: bf16[2,18,18,4], index: 0, kind: input, shape index: {}]   ;;  %s3574_s1 = inlined_call_operand.vmem [shape: bf16[9,4,4], index: 1, kind: input, shape index: {}]   ;;  %s3575_s2 = inlined_call_operand.hbm [shape: f32[1,4], index: 2, kind: input, shape index: {}]   ;;  %s3576_s3 = inlined_call_operand.vmem [shape: bf16[4,64], index: 3, kind: input, shape index: {}]   ;;  %s3577_s4 = inlined_call_operand.vmem [shape: f32[1,64], index: 4, kind: input, shape index: {}]   ;;  %s3578_s5 = inlined_call_operand.vmem [shape: f32[2,256,64], index: 5, kind: output, shape index: {}]  }
   0x1   :  { %s2855_s20 = smov 0   ;;  %s2857_s21 = smov 0  }
   0x2   :  { %s2859_s22 = smov 0  }
   0x3 LB: > { %s2139_s23 = sadd.s32 4294967295, %s2818_s22   ;;  %s25_s24 = sadd.s32 1, %s2810_s20  ;;  %s2818_s22 = sphi %s2859_s22, %s16_s22   ;;  %s2814_s21 = sphi %s2857_s21, %s3597_s21   ;;  %s2810_s20 = sphi %s2855_s20, %s3596_s20   ;;  %s2806_s19 = sphi %s2853_s19, %s3595_s19   ;;  %s2802_s18 = sphi %s2851_s18, %s3594_s18  }
   0x4   : > { %p26_p0 = scmp.ge.s32.totalorder %s25_s24, 2  ;;  %s28_s25 = sadd.s32 1, %s2814_s21 }
   0x5   : > { %p2141_p1 = scmp.ge.s32.totalorder %s2818_s22, 1  ;;  %p171_p2 = scmp.lt.s32.totalorder %s2818_s22, 5 }
   0x6   : > { %s3599_s24 = smov (%p26_p0, %s25_s24), 0  ;;  %s3601_s25 = smov (!%p26_p0, %s28_s25), %s2814_s21 }
   0x7   : > { %p2884_p3 = pnand %p2141_p1, %p171_p2  ;;  %p30_p4 = scmp.ge.s32.totalorder %s3601_s25, 2 }
   0x8   : > { %p2888_p5 = scmp.eq.s32.totalorder %s2139_s23, 0  ;;  %s2820_s28 = smov [#allocation2]  }
   0x9   : > { %s3583_s26 = scalar_select %p2884_p3, 1, 0 }
   0xa   : > { %s3584_s27 = scalar_select %p2888_p5, 1, 0 }
   0xb   : > { %p2691_p6 = pneg %p2884_p3  ;;  %s3603_s25 = smov (%p30_p4, %s3601_s25), 0 }
   0xc   : > { %s187_s29 = sshll.u32 %s2820_s28, 4  ;;  %s2748_s8 = scalar_lea.hbm %s3575_s2, 16  ;;  %s188_s29 = int_to_ptr.vmem [resolvable:$true] %s187_s29 }
   0xd   : > { %p2898_p7 = pnand %p2888_p5, %p2691_p6  ;;  %p2749_p8 = scmp.ne.s32.totalorder %s3575_s2, %s2748_s8 }
   0xe   : > { %p2755_p12 = scmp.lt.u32.totalorder %s2748_s8, %s3575_s2 }
   0xf   : > { %p2750_p9 = pneg %p2898_p7 }
  0x11   : > { %p2751_p10 = pnand %p2750_p9, %p2749_p8 }
  0x13   : > { %p2752_p11 = pneg %p2751_p10 }
  0x15   : > { %p2757_p13 = pnand %p2755_p12, %p2752_p11 }
  0x17   : > { %2760 = shalt.err (!%p2757_p13)
}
  0x18   : > { %s2761_s13 = scalar_lea.vmem %s188_s29, 16  ;;  %s2768_s14 = scalar_lea.vmem %s188_s29, 32 }
  0x19   : > { %p2762_p0 = scmp.ne.s32.totalorder %s188_s29, %s2761_s13  ;;  %p2769_p4 = scmp.lt.s32.totalorder %s188_s29, %s188_s29 }
  0x1a   : > { %p2770_p6 = scmp.lt.s32.totalorder %s2768_s14, %s2761_s13 }
  0x1b   : > { %p2764_p1 = pnand %p2762_p0, %p2750_p9 }
  0x1c   : > { %p2771_p5 = por %p2770_p6, %p2769_p4 }
  0x1d   : > { %p2765_p2 = pneg %p2764_p1 }
  0x1f   : > { %p2772_p3 = pnand %p2771_p5, %p2765_p2 }
  0x21   : > { %2775 = shalt.err (!%p2772_p3)
}
  0x22   : > { %2694 = dma.hbm_to_vmem [thread:$0]  (!%p2898_p7), %s3575_s2, 16, %s188_s29, [#allocation3]  }
  0x23   : > { %p3586_p8 = scmp.ne.s32.totalorder %s3583_s26, 0 }
  0x25   : > { %214 = sbr.rel (%p3586_p8) target bundleno = 670 (0x29e), region = 40 }
  0x2c   : > { %p3587_p10 = scmp.ne.s32.totalorder %s3584_s27, 0 }
  0x2e   : > { %2797 = dma.done.wait (%p3587_p10), [#allocation3], 16  }
  0x2f   : > { %2799 = vsyncadd (%p3587_p10), [#allocation3], 4294967280  ;;  %p246_p5 = scmp.lt.s32.totalorder %s2806_s19, 1  ;;  %s2277_s17 = smul.u32 96, %s2802_s18  ;;  %vm370_vm0 = vcmask 1041408   ;;  %vm345_vm1 = vcmask 31744  }
  0x30   : > { %vm1364_vm2 = vcmask 1042432   ;;  %vm1365_vm3 = vcmask 1046532   ;;  %vm703_vm4 = vsmask.f32 3328  ;;  %v299_v0 = vld [vmem:[%s3574_s1 + $0x6] sm:$0x3] }
  0x31   : > { %s3605_s19 = smov (!%p246_p5, %s2806_s19), 1  ;;  %v300_v1 = vld [vmem:[%s3574_s1 + $0x8] sm:$0x3]  ;;  %v2944_v2 = vld [vmem:[%s3574_s1 + $0xe] sm:$0x3]  ;;  %2676 = vmatprep.subr.msk.bf16.mxu1 %vm370_vm0, %v299_v0  ;;  %v372_v3 = vsel %vm370_vm0, %v299_v0, 0  ;;  %vm2956_vm5 = vmor %vm1364_vm2, %vm1365_vm3 }
  0x32   : > { %s2686_s23 = smul.u32 216, %s3605_s19  ;;  %2680 = vmatprep.subr.msk.bf16.mxu0 %vm370_vm0, %v300_v1  ;;  %v1117_v6 = vsel %vm370_vm0, %v300_v1, 0  ;;  %2369 = vmatpush3.bf16.msra.mxu1 %v372_v3  ;;  %vm704_vm6 = vsmask.f32 7440  ;;  %v304_v9 = vld [vmem:[%s3574_s1 + $0x10] sm:$0x3] }
  0x33   : > { %2441 = vmatpush3.bf16.msra.mxu0 %v1117_v6  ;;  %vm3020_vm7 = vmor %vm703_vm4, %vm704_vm6  ;;  %s2147_s7 = sshll.u32 %s2802_s18, 4  ;;  %s2148_s8 = sshll.u32 %s3605_s19, 5  ;;  %vm2024_vm8 = vcmask 523264  }
  0x34   : > { %s250_s26 = scalar_lea.vmem %s3573_s0, %s2686_s23  ;;  %2681 = vmatprep.subr.msk.bf16.mxu0 %vm370_vm0, %v2944_v2  ;;  %p254_p3 = scmp.lt.s32.totalorder %s2147_s7, 31 }
  0x35   : > { %s2936_s6 = scalar_lea.vmem %s250_s26, %s2277_s17 }
  0x36   : > { %v269_v4 = vld [vmem:[%s2936_s6 + $0xc] sm:$0xf]  ;;  %v270_v5 = vld [vmem:[%s2936_s6 + $0x10] sm:$0xf]  ;;  %v2961_v10 = vld [vmem:[%s2936_s6 + $0x18] sm:$0xf] }
  0x37   : > { %v2952_v7 = vcombine.low %v269_v4, %v270_v5  ;;  %v731_v8 = vshrl.u32 %v269_v4, 16  ;;  %v734_v11 = vshll.u32 %v269_v4, 16  ;;  %v744_v12 = vshrl.u32 %v270_v5, 16  ;;  %v2964_v15 = vld [vmem:[%s2936_s6 + $0x1c] sm:$0xf]  ;;  %s3607_s7 = smov (!%p254_p3, %s2147_s7), 31 }
  0x38   : > { %v2222_v13 = vrot.slane %v269_v4, 9  ;;  %v1376_v14 = vrot.slane %v270_v5, 5  ;;  %v2972_v16 = vcombine.low %v2961_v10, %v2964_v15  ;;  %v755_v17 = vshrl.u32 %v2961_v10, 16  ;;  %v2977_v19 = vld [vmem:[%s2936_s6 + $0x24] sm:$0xf]  ;;  %s257_s9 = sadd.s32 %s2148_s8, %s3607_s7 }
  0x39   : > { %2370 = vmatprep.mubr.msk.bf16.mxu1 %vm345_vm1, %v2952_v7  ;;  %v758_v18 = vshll.u32 %v2961_v10, 16  ;;  %v2980_v20 = vld [vmem:[%s2936_s6 + $0x28] sm:$0xf]  ;;  %v768_v22 = vshrl.u32 %v2964_v15, 16  ;;  %v2990_v24 = vld [vmem:[%s2936_s6 + $0x30] sm:$0xf] }
  0x3a   : > { %v1377_v21 = vsel %vm2956_vm5, %v2222_v13, %v1376_v14  ;;  %v2987_v23 = vcombine.low %v2977_v19, %v2980_v20  ;;  %v2993_v25 = vld [vmem:[%s2936_s6 + $0x34] sm:$0xf]  ;;  %v733_v26 = vrot.slane %v731_v8, 4  ;;  %v1378_v27 = vrot.slane %v1376_v14, 4  ;;  %2371 = vmatmul.mubr.msk.bf16.vlgmr.msra.gmra.mrb[0].mxu1 %vm345_vm1, %v2972_v16  ;;  %v3009_v36 = vld [vmem:[%s2936_s6 + $0x20] sm:$0x1] }
  0x3b   : > { %v779_v28 = vshrl.u32 %v2977_v19, 16  ;;  %v782_v29 = vshll.u32 %v2977_v19, 16  ;;  %v792_v30 = vshrl.u32 %v2980_v20, 16  ;;  %v271_v31 = vld [vmem:[%s2936_s6 + $0x14] sm:$0x1]  ;;  %v3005_v32 = vcombine.low %v2990_v24, %v2993_v25  ;;  %s2149_s10 = sshll.u32 %s257_s9, 3 }
  0x3c   : > { %2374 = vmatprep.mubr.msk.bf16.mxu1 %vm345_vm1, %v2987_v23  ;;  %v803_v33 = vshrl.u32 %v2990_v24, 16  ;;  %v736_v34 = vrot.slane %v734_v11, 5  ;;  %v740_v35 = vshll.u32 %v270_v5, 16  ;;  %v746_v37 = vrot.slane %v744_v12, 4  ;;  %v3012_v41 = vld [vmem:[%s2936_s6 + $0x3c] sm:$0xf]  ;;  %s3524_s15 = scalar_lea.vmem %s3578_s5, %s2149_s10 }
  0x3d   : > { %v750_v38 = vshll.u32 %v271_v31, 16  ;;  %v1379_v39 = vrot.slane %v271_v31, 5  ;;  %v757_v40 = vrot.slane %v755_v17, 4  ;;  %v760_v44 = vrot.slane %v758_v18, 5  ;;  %v3016_v46 = vld [vmem:[%s2936_s6 + $0x40] sm:$0xf] }
  0x3e   : > { %v737_v42 = vor.u32 %v736_v34, %v733_v26  ;;  %v742_v43 = vrot.slane %v740_v35, 5  ;;  %v764_v45 = vshll.u32 %v2964_v15, 16  ;;  %v770_v50 = vrot.slane %v768_v22, 4  ;;  %v3035_v59 = vld [vmem:[%s2936_s6 + $0x48] sm:$0xf] }
  0x3f   : > { %v752_v48 = vrot.slane %v750_v38, 5  ;;  %v1380_v49 = vsel %vm2956_vm5, %v1378_v27, %v1379_v39  ;;  %v774_v51 = vshll.u32 %v3009_v36, 16  ;;  %v761_v55 = vor.u32 %v760_v44, %v757_v40  ;;  %v3038_v60 = vld [vmem:[%s2936_s6 + $0x4c] sm:$0xf]  ;;  %v3069_v22 = vld [vmem:[%s2936_s6 + $0x54] sm:$0xf] }
  0x40   : > { %v738_v52 = vrot.slane %v737_v42, 4  ;;  %v747_v53 = vor.u32 %v746_v37, %v742_v43  ;;  %v3027_v54 = vcombine.low %v1377_v21, %v1380_v49  ;;  %v806_v56 = vshll.u32 %v2990_v24, 16  ;;  %v3049_v6 = vld [vmem:[%s2936_s6 + $0x2c] sm:$0x1]  ;;  %v3066_v21 = vld [vmem:[%s2936_s6 + $0x38] sm:$0x1] }
  0x41   : > { %v766_v57 = vrot.slane %v764_v45, 5  ;;  %v3032_v58 = vcombine.low %v3012_v41, %v3016_v46  ;;  %v816_v61 = vshrl.u32 %v2993_v25, 16  ;;  %v762_v0 = vrot.slane %v761_v55, 4  ;;  %v3076_v35 = vld [vmem:[%s3574_s1] sm:$0x3] }
  0x42   : > { %v743_v62 = vsel %vm3020_vm7, %v738_v52, %v742_v43  ;;  %v748_v63 = vrot.slane %v747_v53, 4  ;;  %2375 = vmatmul.mubr.msk.bf16.gmra.mrb[4].mxu1 %vm345_vm1, %v3005_v32  ;;  %v776_v3 = vrot.slane %v774_v51, 5  ;;  %v1239_v4 = vsel %vm370_vm0, %v2944_v2, 0  ;;  %v3084_v39 = vld [vmem:[%s2936_s6 + $0x58] sm:$0xf]  ;;  %2677 = vmatprep.subr.msk.bf16.mxu1 %vm370_vm0, %v3076_v35 }
  0x43   : > { %v771_v1 = vor.u32 %v770_v50, %v766_v57  ;;  %v827_v5 = vshrl.u32 %v3012_v41, 16  ;;  %2378 = vmatprep.mubr.msk.bf16.mxu1 %vm345_vm1, %v3032_v58  ;;  %v830_v11 = vshll.u32 %v3012_v41, 16  ;;  %v840_v12 = vshrl.u32 %v3016_v46, 16  ;;  %v3099_v53 = vld [vmem:[%s2936_s6 + $0x60] sm:$0xf] }
  0x44   : > { %v753_v8 = vsel %vm3020_vm7, %v748_v63, %v752_v48  ;;  %v3059_v13 = vcombine.low %v3035_v59, %v3038_v60  ;;  %v767_v2 = vsel %vm3020_vm7, %v762_v0, %v766_v57  ;;  %v781_v18 = vrot.slane %v779_v28, 4  ;;  %v3104_v55 = vld [vmem:[%s3574_s1 + $0x4] sm:$0x3] }
  0x45   : > { %v3061_v14 = vcombine.low %v743_v62, %v753_v8  ;;  %v772_v17 = vrot.slane %v771_v1, 4  ;;  %v784_v26 = vrot.slane %v782_v29, 5  ;;  %v788_v27 = vshll.u32 %v2980_v20, 16  ;;  %v3110_v63 = vld [vmem:[%s2936_s6 + $0x64] sm:$0xf] }
  0x46   : > { %v794_v31 = vrot.slane %v792_v30, 4  ;;  %v798_v34 = vshll.u32 %v3049_v6, 16  ;;  %v805_v37 = vrot.slane %v803_v33, 4  ;;  %v808_v38 = vrot.slane %v806_v56, 5 }
  0x47   : > { %3592 = vst [vmem:[#allocation5_spill] sm:$0xff] %v3061_v14  ;;  %2442 = vmatprep.mubr.msk.bf16.mxu0 %vm345_vm1, %v3061_v14  ;;  %v777_v28 = vsel %vm3020_vm7, %v772_v17, %v776_v3  ;;  %v812_v29 = vshll.u32 %v2993_v25, 16  ;;  %v851_v40 = vshrl.u32 %v3035_v59, 16  ;;  %v785_v42 = vor.u32 %v784_v26, %v781_v18  ;;  %v3125_v26 = vld [vmem:[%s2936_s6 + $0x44] sm:$0x1] }
  0x48   : > { %v3088_v30 = vcombine.low %v767_v2, %v777_v28  ;;  %v790_v43 = vrot.slane %v788_v27, 5  ;;  %v809_v44 = vor.u32 %v808_v38, %v805_v37  ;;  %v818_v48 = vrot.slane %v816_v61, 4 }
  0x49   : > { %v814_v45 = vrot.slane %v812_v29, 5  ;;  %v822_v33 = vshll.u32 %v3066_v21, 16  ;;  %v786_v49 = vrot.slane %v785_v42, 4  ;;  %v800_v51 = vrot.slane %v798_v34, 5 }
  0x4a   : > { %2443 = vmatmul.mubr.msk.bf16.vlgmr.msra.gmra.mrb[0].mxu0 %vm345_vm1, %v3088_v30  ;;  %v795_v50 = vor.u32 %v794_v31, %v790_v43  ;;  %v3096_v52 = vcombine.low %v3069_v22, %v3084_v39  ;;  %2379 = vmatmul.mubr.msk.bf16.gmra.mrb[8].mxu1 %vm345_vm1, %v3059_v13  ;;  %v854_v56 = vshll.u32 %v3035_v59, 16  ;;  %v810_v57 = vrot.slane %v809_v44, 4 }
  0x4b   : > { %2459 = vmatpush3.bf16.msra.mxu0 %v1239_v4  ;;  %v819_v61 = vor.u32 %v818_v48, %v814_v45  ;;  %v824_v62 = vrot.slane %v822_v33, 5  ;;  %v864_v0 = vshrl.u32 %v3038_v60, 16  ;;  %v791_v1 = vsel %vm3020_vm7, %v786_v49, %v790_v43  ;;  %v3139_v43 = vld [vmem:[%s2936_s6 + $0x50] sm:$0x1]  ;;  %v3145_v49 = vld [vmem:[%s2936_s6] sm:$0xf] }
  0x4c   : > { %v796_v3 = vrot.slane %v795_v50, 4  ;;  %2382 = vmatprep.mubr.msk.bf16.mxu1 %vm345_vm1, %v3096_v52  ;;  %v875_v4 = vshrl.u32 %v3069_v22, 16  ;;  %2682 = vmatprep.subr.msk.bf16.mxu0 %vm370_vm0, %v3104_v55  ;;  %v815_v8 = vsel %vm3020_vm7, %v810_v57, %v814_v45  ;;  %v878_v17 = vshll.u32 %v3069_v22, 16 }
  0x4d   : > { %v820_v2 = vrot.slane %v819_v61, 4  ;;  %v888_v18 = vshrl.u32 %v3084_v39, 16  ;;  %v3131_v31 = vcombine.low %v3099_v53, %v3110_v63  ;;  %v829_v34 = vrot.slane %v827_v5, 4  ;;  %v3148_v5 = vld [vmem:[%s2936_s6 + $0x4] sm:$0xf] }
  0x4e   : > { %v801_v27 = vsel %vm3020_vm7, %v796_v3, %v800_v51  ;;  %v832_v28 = vrot.slane %v830_v11, 5  ;;  %v836_v29 = vshll.u32 %v3016_v46, 16  ;;  %v842_v42 = vrot.slane %v840_v12, 4 }
  0x4f   : > { %v3133_v37 = vcombine.low %v791_v1, %v801_v27  ;;  %v825_v38 = vsel %vm3020_vm7, %v820_v2, %v824_v62  ;;  %v846_v48 = vshll.u32 %v3125_v26, 16  ;;  %v853_v33 = vrot.slane %v851_v40, 4  ;;  %v302_v1 = vld [vmem:[%s3574_s1 + $0xc] sm:$0x3] }
  0x50   : > { %v3141_v44 = vcombine.low %v815_v8, %v825_v38  ;;  %v833_v45 = vor.u32 %v832_v28, %v829_v34  ;;  %v838_v11 = vrot.slane %v836_v29, 5  ;;  %v856_v50 = vrot.slane %v854_v56, 5  ;;  %v3171_v28 = vld [vmem:[%s2936_s6 + $0x5c] sm:$0x1] }
  0x51   : > { %2446 = vmatprep.mubr.msk.bf16.mxu0 %vm345_vm1, %v3133_v37  ;;  %v860_v51 = vshll.u32 %v3038_v60, 16  ;;  %v866_v12 = vrot.slane %v864_v0, 4  ;;  %v848_v61 = vrot.slane %v846_v48, 5  ;;  %v870_v40 = vshll.u32 %v3139_v43, 16 }
  0x52   : > { %2447 = vmatmul.mubr.msk.bf16.gmra.mrb[4].mxu0 %vm345_vm1, %v3141_v44  ;;  %v834_v57 = vrot.slane %v833_v45, 4  ;;  %v480_v62 = vsel %vm370_vm0, %v3076_v35, 0  ;;  %2383 = vmatmul.mubr.msk.bf16.gmra.mrb[12].mxu1 %vm345_vm1, %v3131_v31  ;;  %v843_v56 = vor.u32 %v842_v42, %v838_v11  ;;  %v857_v0 = vor.u32 %v856_v50, %v853_v33 }
  0x53   : > { %v862_v3 = vrot.slane %v860_v51, 5  ;;  %v2169_v8 = vcombine.low %v3145_v49, %v3148_v5  ;;  %v899_v2 = vshrl.u32 %v3099_v53, 16  ;;  %v902_v27 = vshll.u32 %v3099_v53, 16  ;;  %2387 = vmatpush3.bf16.msra.mxu1 %v480_v62 }
  0x54   : > { %v912_v34 = vshrl.u32 %v3110_v63, 16  ;;  %v839_v35 = vsel %vm3020_vm7, %v834_v57, %v838_v11  ;;  %v844_v38 = vrot.slane %v843_v56, 4  ;;  %v858_v29 = vrot.slane %v857_v0, 4  ;;  %2678 = vmatprep.subr.msk.bf16.mxu1 %vm370_vm0, %v302_v1 }
  0x55   : > { %v867_v42 = vor.u32 %v866_v12, %v862_v3  ;;  %v872_v45 = vrot.slane %v870_v40, 5  ;;  %2388 = vmatprep.mubr.msk.bf16.mxu1 %vm345_vm1, %v2169_v8  ;;  %v877_v48 = vrot.slane %v875_v4, 4  ;;  %v880_v33 = vrot.slane %v878_v17, 5  ;;  %v3184_v8 = vld [vmem:[%s2936_s6 + $0x68] sm:$0x1] }
  0x56   : > { %v884_v50 = vshll.u32 %v3084_v39, 16  ;;  %v890_v51 = vrot.slane %v888_v18, 4  ;;  %v849_v11 = vsel %vm3020_vm7, %v844_v38, %v848_v61  ;;  %v863_v57 = vsel %vm3020_vm7, %v858_v29, %v862_v3 }
  0x57   : > { %v868_v62 = vrot.slane %v867_v42, 4  ;;  %v894_v56 = vshll.u32 %v3171_v28, 16  ;;  %v3181_v12 = vcombine.low %v839_v35, %v849_v11  ;;  %v881_v40 = vor.u32 %v880_v33, %v877_v48  ;;  %v3211_v11 = vld [vmem:[%s2936_s6 + $0x6c] sm:$0xf] }
  0x58   : > { %v886_v0 = vrot.slane %v884_v50, 5  ;;  %v901_v4 = vrot.slane %v899_v2, 4  ;;  %v904_v14 = vrot.slane %v902_v27, 5  ;;  %v908_v61 = vshll.u32 %v3110_v63, 16  ;;  %v3199_v27 = vld [vmem:[%s3574_s1 + $0x2] sm:$0x3] }
  0x59   : > { %v873_v17 = vsel %vm3020_vm7, %v868_v62, %v872_v45  ;;  %v896_v18 = vrot.slane %v894_v56, 5  ;;  %2450 = vmatprep.mubr.msk.bf16.mxu0 %vm345_vm1, %v3181_v12  ;;  %v882_v38 = vrot.slane %v881_v40, 4  ;;  %v914_v29 = vrot.slane %v912_v34, 4 }
  0x5a   : > { %v3191_v3 = vcombine.low %v863_v57, %v873_v17  ;;  %v891_v35 = vor.u32 %v890_v51, %v886_v0  ;;  %2389 = vmatmul.mubr.msk.bf16.vlgmr.msra.gmra.mrb[0].mxu1 %vm345_vm1, %v2952_v7  ;;  %v905_v2 = vor.u32 %v904_v14, %v901_v4  ;;  %v910_v42 = vrot.slane %v908_v61, 5 }
  0x5b   : > { %v918_v45 = vshll.u32 %v3184_v8, 16  ;;  %v887_v34 = vsel %vm3020_vm7, %v882_v38, %v886_v0  ;;  %2392 = vmatprep.mubr.msk.bf16.mxu1 %vm345_vm1, %v2972_v16  ;;  %v588_v7 = vsel %vm370_vm0, %v302_v1, 0  ;;  %v3220_v1 = vld [vmem:[%s2936_s6 + $0x70] sm:$0xf]  ;;  %v923_v0 = vshrl.u32 %v3211_v11, 16 }
  0x5c   : > { %2451 = vmatmul.mubr.msk.bf16.gmra.mrb[8].mxu0 %vm345_vm1, %v3191_v3  ;;  %v892_v48 = vrot.slane %v891_v35, 4  ;;  %v906_v14 = vrot.slane %v905_v2, 4  ;;  %v915_v33 = vor.u32 %v914_v29, %v910_v42  ;;  %2405 = vmatpush3.bf16.msra.mxu1 %v588_v7  ;;  %v926_v17 = vshll.u32 %v3211_v11, 16 }
  0x5d   : > { %v920_v50 = vrot.slane %v918_v45, 5  ;;  %2679 = vmatprep.subr.msk.bf16.mxu1 %vm370_vm0, %v3199_v27  ;;  %v707_v61 = vshrl.u32 %v3145_v49, 16  ;;  %v710_v38 = vshll.u32 %v3145_v49, 16  ;;  %v936_v35 = vshrl.u32 %v3220_v1, 16 }
  0x5e   : > { %v897_v51 = vsel %vm3020_vm7, %v892_v48, %v896_v18  ;;  %v911_v62 = vsel %vm3020_vm7, %v906_v14, %v910_v42  ;;  %v916_v56 = vrot.slane %v915_v33, 4  ;;  %v932_v18 = vshll.u32 %v3220_v1, 16  ;;  %v3243_v42 = vld [vmem:[%s2936_s6 + $0x74] sm:$0x1] }
  0x5f   : > { %v3215_v57 = vcombine.low %v887_v34, %v897_v51  ;;  %v2223_v29 = vrot.slane %v2961_v10, 9  ;;  %v720_v2 = vshrl.u32 %v3148_v5, 16  ;;  %v1383_v45 = vrot.slane %v2964_v15, 5 }
  0x60   : > { %v921_v40 = vsel %vm3020_vm7, %v916_v56, %v920_v50  ;;  %v1386_v34 = vrot.slane %v3009_v36, 5  ;;  %v2224_v48 = vrot.slane %v2977_v19, 9  ;;  %v1486_v10 = vsel %vm370_vm0, %v3104_v55, 0 }
  0x61   : > { %2454 = vmatprep.mubr.msk.bf16.mxu0 %vm345_vm1, %v3215_v57  ;;  %v3227_v4 = vcombine.low %v911_v62, %v921_v40  ;;  %v3252_v7 = vrot.slane %v923_v0, 4  ;;  %v1390_v14 = vrot.slane %v2980_v20, 5  ;;  %v1393_v33 = vrot.slane %v3049_v6, 5 }
  0x62   : > { %2393 = vmatmul.mubr.msk.bf16.gmra.mrb[4].mxu1 %vm345_vm1, %v2987_v23  ;;  %v3256_v50 = vrot.slane %v926_v17, 5  ;;  %v3258_v51 = vrot.slane %v932_v18, 5  ;;  %v1384_v15 = vsel %vm2956_vm5, %v2223_v29, %v1383_v45  ;;  %v1385_v19 = vrot.slane %v1383_v45, 4 }
  0x63   : > { %2396 = vmatprep.mubr.msk.bf16.mxu1 %vm345_vm1, %v3005_v32  ;;  %v3262_v36 = vrot.slane %v936_v35, 4  ;;  %v942_v62 = vshll.u32 %v3243_v42, 16  ;;  %v1391_v55 = vsel %vm2956_vm5, %v2224_v48, %v1390_v14  ;;  %v1392_v56 = vrot.slane %v1390_v14, 4 }
  0x64   : > { %2455 = vmatmul.mubr.msk.bf16.gmra.mrb[12].mxu0 %vm345_vm1, %v3227_v4  ;;  %v1387_v20 = vsel %vm2956_vm5, %v1385_v19, %v1386_v34  ;;  %v2225_v6 = vrot.slane %v2990_v24, 9  ;;  %v1397_v40 = vrot.slane %v2993_v25, 5  ;;  %v1400_v0 = vrot.slane %v3066_v21, 5 }
  0x65   : > { %2460 = vmatprep.mubr.msk.bf16.mxu0 %vm345_vm1, %v3088_v30  ;;  %v3272_v17 = vcombine.low %v1384_v15, %v1387_v20  ;;  %v1394_v18 = vsel %vm2956_vm5, %v1392_v56, %v1393_v33  ;;  %v2226_v35 = vrot.slane %v3012_v41, 9  ;;  %v1404_v29 = vrot.slane %v3016_v46, 5  ;;  %v3290_v41 = vld [vmem:[%s3574_s1 + $0xa] sm:$0x3] }
  0x66   : > { %v3278_v45 = vcombine.low %v1391_v55, %v1394_v18  ;;  %v1398_v34 = vsel %vm2956_vm5, %v2225_v6, %v1397_v40  ;;  %v1399_v24 = vrot.slane %v1397_v40, 4  ;;  %v1407_v25 = vrot.slane %v3125_v26, 5  ;;  %v3299_v26 = vld [vmem:[%s2936_s6 + $0x8] sm:$0x1] }
  0x67   : > { %v929_v21 = vor.u32 %v3256_v50, %v3252_v7  ;;  %v1405_v46 = vsel %vm2956_vm5, %v2226_v35, %v1404_v29  ;;  %v1406_v48 = vrot.slane %v1404_v29, 4  ;;  %v709_v14 = vrot.slane %v707_v61, 4 }
  0x68   : > { %v1401_v7 = vsel %vm2956_vm5, %v1399_v24, %v1400_v0  ;;  %v712_v33 = vrot.slane %v710_v38, 5  ;;  %v716_v50 = vshll.u32 %v3148_v5, 16  ;;  %v722_v15 = vrot.slane %v720_v2, 4 }
  0x69   : > { %v3306_v61 = vcombine.low %v1398_v34, %v1401_v7  ;;  %v1408_v19 = vsel %vm2956_vm5, %v1406_v48, %v1407_v25  ;;  %v726_v55 = vshll.u32 %v3299_v26, 16  ;;  %v2227_v56 = vrot.slane %v3035_v59, 9 }
  0x6a   : > { %2397 = vmatmul.mubr.msk.bf16.gmra.mrb[8].mxu1 %vm345_vm1, %v3032_v58  ;;  %v3314_v38 = vcombine.low %v1405_v46, %v1408_v19  ;;  %v713_v20 = vor.u32 %v712_v33, %v709_v14  ;;  %v718_v2 = vrot.slane %v716_v50, 5  ;;  %v1414_v40 = vrot.slane %v3139_v43, 5 }
  0x6b   : > { %2400 = vmatprep.mubr.msk.bf16.mxu1 %vm345_vm1, %v3059_v13  ;;  %v728_v6 = vrot.slane %v726_v55, 5  ;;  %v2228_v0 = vrot.slane %v3069_v22, 9  ;;  %v1418_v18 = vrot.slane %v3084_v39, 5  ;;  %v939_v24 = vor.u32 %v3262_v36, %v3258_v51 }
  0x6c   : > { %2461 = vmatmul.mubr.msk.bf16.vlgmr.msra.gmra.mrb[0].mxu0 %vm345_vm1, %v3133_v37  ;;  %v714_v35 = vrot.slane %v713_v20, 4  ;;  %v723_v29 = vor.u32 %v722_v15, %v718_v2  ;;  %v1421_v46 = vrot.slane %v3171_v28, 5  ;;  %v2229_v48 = vrot.slane %v3099_v53, 9 }
  0x6d   : > { %2477 = vmatpush3.bf16.msra.mxu0 %v1486_v10  ;;  %2464 = vmatprep.mubr.msk.bf16.mxu0 %vm345_vm1, %v3141_v44  ;;  %v1411_v10 = vrot.slane %v3038_v60, 5  ;;  %v1419_v25 = vsel %vm2956_vm5, %v2228_v0, %v1418_v18  ;;  %v1420_v60 = vrot.slane %v1418_v18, 4  ;;  %v1425_v7 = vrot.slane %v3110_v63, 5 }
  0x6e   : > { %2683 = vmatprep.subr.msk.bf16.mxu0 %vm370_vm0, %v3290_v41  ;;  %v719_v22 = vsel %vm3020_vm7, %v714_v35, %v718_v2  ;;  %v724_v43 = vrot.slane %v723_v29, 4  ;;  %v1428_v28 = vrot.slane %v3184_v8, 5  ;;  %v2230_v50 = vrot.slane %v3211_v11, 9 }
  0x6f   : > { %v1412_v59 = vsel %vm2956_vm5, %v2227_v56, %v1411_v10  ;;  %v1413_v34 = vrot.slane %v1411_v10, 4  ;;  %v1422_v36 = vsel %vm2956_vm5, %v1420_v60, %v1421_v46  ;;  %v1432_v15 = vrot.slane %v3220_v1, 5 }
  0x70   : > { %v729_v53 = vsel %vm3020_vm7, %v724_v43, %v728_v6  ;;  %v3346_v33 = vcombine.low %v1419_v25, %v1422_v36  ;;  %v1426_v8 = vsel %vm2956_vm5, %v2229_v48, %v1425_v7  ;;  %v1427_v19 = vrot.slane %v1425_v7, 4 }
  0x71   : > { %v1415_v39 = vsel %vm2956_vm5, %v1413_v34, %v1414_v40  ;;  %v2187_v63 = vcombine.low %v719_v22, %v729_v53  ;;  %v1435_v55 = vrot.slane %v3243_v42, 5  ;;  %v3358_v56 = vsel %vm2956_vm5, %v2230_v50, %v1432_v15 }
  0x72   : > { %2401 = vmatmul.mubr.msk.bf16.gmra.mrb[12].mxu1 %vm345_vm1, %v3096_v52  ;;  %v3334_v14 = vcombine.low %v1412_v59, %v1415_v39  ;;  %v1434_v20 = vrot.slane %v1432_v15, 4  ;;  %v1429_v2 = vsel %vm2956_vm5, %v1427_v19, %v1428_v28  ;;  %v930_v40 = vrot.slane %v929_v21, 4 }
  0x73   : > { %2406 = vmatprep.mubr.msk.bf16.mxu1 %vm345_vm1, %v2972_v16  ;;  %v1369_v16 = vrot.slane %v3148_v5, 5  ;;  %v3362_v10 = vcombine.low %v1426_v8, %v1429_v2  ;;  %v940_v0 = vrot.slane %v939_v24, 4  ;;  %v944_v18 = vrot.slane %v942_v62, 5  ;;  %v3486_v24 = vld [vmem:[#allocation2] ss:$0 sm:$0xff] }
  0x74   : > { %2465 = vmatmul.mubr.msk.bf16.gmra.mrb[4].mxu0 %vm345_vm1, %v3181_v12  ;;  %v3366_v6 = vsel %vm2956_vm5, %v1434_v20, %v1435_v55  ;;  %v2221_v35 = vrot.slane %v3145_v49, 9  ;;  %v1372_v59 = vrot.slane %v3299_v26, 5  ;;  %v995_v34 = vsel %vm370_vm0, %v3199_v27, 0 }
  0x75   : > { %2468 = vmatprep.mubr.msk.bf16.mxu0 %vm345_vm1, %v3191_v3  ;;  %v2256_v5 = vcombine.low %v3358_v56, %v3366_v6  ;;  %v1371_v29 = vrot.slane %v1369_v16, 4  ;;  %v935_v49 = vsel %vm3020_vm7, %v930_v40, %v3258_v51  ;;  %v945_v42 = vsel %vm3020_vm7, %v940_v0, %v944_v18 }
  0x76   : > { %v2212_v62 = vcombine.low %v935_v49, %v945_v42  ;;  %v2178_v47 = vcombine.low %v3211_v11, %v3220_v1 }
  0x77   : > { %v1373_v27 = vsel %vm2956_vm5, %v1371_v29, %v1372_v59 }
  0x7a   : > { %2407 = vmatmul.mubr.msk.bf16.vlgmr.msra.gmra.mrb[0].mxu1 %vm345_vm1, %v2987_v23  ;;  %v1370_v23 = vsel %vm2956_vm5, %v2221_v35, %v1369_v16 }
  0x7b   : > { %2410 = vmatprep.mubr.msk.bf16.mxu1 %vm345_vm1, %v3005_v32  ;;  %2423 = vmatpush3.bf16.msra.mxu1 %v995_v34  ;;  %v2231_v21 = vcombine.low %v1370_v23, %v1373_v27  ;;  %v1608_v32 = vsel %vm370_vm0, %v3290_v41, 0 }
  0x7c   : > { %2469 = vmatmul.mubr.msk.bf16.gmra.mrb[8].mxu0 %vm345_vm1, %v3215_v57 }
  0x7d   : > { %2472 = vmatprep.mubr.msk.bf16.mxu0 %vm345_vm1, %v3227_v4 }
  0x82   : > { %2411 = vmatmul.mubr.msk.bf16.gmra.mrb[4].mxu1 %vm345_vm1, %v3032_v58  ;;  %v3593_v58 = vld [vmem:[#allocation5_spill] sm:$0xff] }
  0x83   : > { %2414 = vmatprep.mubr.msk.bf16.mxu1 %vm345_vm1, %v3059_v13  ;;  %v1730_v13 = vsel %vm370_vm0, %v304_v9, 0 }
  0x84   : > { %2473 = vmatmul.mubr.msk.bf16.gmra.mrb[12].mxu0 %vm345_vm1, %v2212_v62 }
  0x85   : > { %2478 = vmatprep.mubr.msk.bf16.mxu0 %vm345_vm1, %v2231_v21 }
  0x8a   : > { %2415 = vmatmul.mubr.msk.bf16.gmra.mrb[8].mxu1 %vm345_vm1, %v3096_v52 }
  0x8b   : > { %2418 = vmatprep.mubr.msk.bf16.mxu1 %vm345_vm1, %v3131_v31 }
  0x8c   : > { %2479 = vmatmul.mubr.msk.bf16.vlgmr.msra.gmra.mrb[0].mxu0 %vm345_vm1, %v3027_v54 }
  0x8d   : > { %2495 = vmatpush3.bf16.msra.mxu0 %v1608_v32  ;;  %2482 = vmatprep.mubr.msk.bf16.mxu0 %vm345_vm1, %v3272_v17 }
  0x8e   : > { %2684 = vmatprep.subr.msk.bf16.mxu0 %vm370_vm0, %v304_v9 }
  0x92   : > { %2419 = vmatmul.mubr.msk.bf16.gmra.mrb[12].mxu1 %vm345_vm1, %v2178_v47 }
  0x93   : > { %2424 = vmatprep.mubr.msk.bf16.mxu1 %vm345_vm1, %v2187_v63 }
  0x94   : > { %2483 = vmatmul.mubr.msk.bf16.gmra.mrb[4].mxu0 %vm345_vm1, %v3278_v45 }
  0x95   : > { %2486 = vmatprep.mubr.msk.bf16.mxu0 %vm345_vm1, %v3306_v61 }
  0x9a   : > { %2425 = vmatmul.mubr.msk.bf16.vlgmr.msra.gmra.mrb[0].mxu1 %vm345_vm1, %v3593_v58 }
  0x9b   : > { %2428 = vmatprep.mubr.msk.bf16.mxu1 %vm345_vm1, %v3088_v30 }
  0x9c   : > { %2487 = vmatmul.mubr.msk.bf16.gmra.mrb[8].mxu0 %vm345_vm1, %v3314_v38 }
  0x9d   : > { %2490 = vmatprep.mubr.msk.bf16.mxu0 %vm345_vm1, %v3334_v14 }
  0xa2   : > { %2429 = vmatmul.mubr.msk.bf16.gmra.mrb[4].mxu1 %vm345_vm1, %v3133_v37 }
  0xa3   : > { %2432 = vmatprep.mubr.msk.bf16.mxu1 %vm345_vm1, %v3141_v44 }
  0xa4   : > { %2491 = vmatmul.mubr.msk.bf16.gmra.mrb[12].mxu0 %vm345_vm1, %v3346_v33 }
  0xa5   : > { %2496 = vmatprep.mubr.msk.bf16.mxu0 %vm345_vm1, %v3027_v54  ;;  %v1892_v54 = vld [vmem:[%s3576_s3] sm:$0x3] }
  0xa6   : > { %2685 = vmatprep.subr.msk.bf16.mxu1 %vm370_vm0, %v1892_v54  ;;  %v1925_v30 = vsel %vm370_vm0, %v1892_v54, 0 }
  0xa7   : > { %2531 = vmatpush3.bf16.msra.mxu1 %v1925_v30 }
  0xaa   : > { %2433 = vmatmul.mubr.msk.bf16.gmra.mrb[8].mxu1 %vm345_vm1, %v3181_v12 }
  0xab   : > { %2436 = vmatprep.mubr.msk.bf16.mxu1 %vm345_vm1, %v3191_v3 }
  0xac   : > { %2497 = vmatmul.mubr.msk.bf16.vlgmr.msra.gmra.mrb[0].mxu0 %vm345_vm1, %v3272_v17 }
  0xad   : > { %2513 = vmatpush3.bf16.msra.mxu0 %v1730_v13  ;;  %2500 = vmatprep.mubr.msk.bf16.mxu0 %vm345_vm1, %v3278_v45 }
  0xb2   : > { %2437 = vmatmul.mubr.msk.bf16.gmra.mrb[12].mxu1 %vm345_vm1, %v3215_v57 }
  0xb4   : > { %2501 = vmatmul.mubr.msk.bf16.gmra.mrb[4].mxu0 %vm345_vm1, %v3306_v61 }
  0xb5   : > { %2504 = vmatprep.mubr.msk.bf16.mxu0 %vm345_vm1, %v3314_v38 }
  0xbc   : > { %2505 = vmatmul.mubr.msk.bf16.gmra.mrb[8].mxu0 %vm345_vm1, %v3334_v14 }
  0xbd   : > { %2508 = vmatprep.mubr.msk.bf16.mxu0 %vm345_vm1, %v3346_v33 }
  0xc4   : > { %2509 = vmatmul.mubr.msk.bf16.gmra.mrb[12].mxu0 %vm345_vm1, %v3362_v10 }
  0xc5   : > { %2514 = vmatprep.mubr.msk.bf16.mxu0 %vm345_vm1, %v3272_v17 }
  0xcc   : > { %2515 = vmatmul.mubr.msk.bf16.vlgmr.msra.gmra.mrb[0].mxu0 %vm345_vm1, %v3278_v45 }
  0xcd   : > { %2518 = vmatprep.mubr.msk.bf16.mxu0 %vm345_vm1, %v3306_v61 }
  0xd4   : > { %2519 = vmatmul.mubr.msk.bf16.gmra.mrb[4].mxu0 %vm345_vm1, %v3314_v38 }
  0xd5   : > { %2522 = vmatprep.mubr.msk.bf16.mxu0 %vm345_vm1, %v3334_v14 }
  0xdc   : > { %2523 = vmatmul.mubr.msk.bf16.gmra.mrb[8].mxu0 %vm345_vm1, %v3346_v33 }
  0xdd   : > { %2526 = vmatprep.mubr.msk.bf16.mxu0 %vm345_vm1, %v3362_v10 }
  0xe4   : > { %2527 = vmatmul.mubr.msk.bf16.gmra.mrb[12].mxu0 %vm345_vm1, %v2256_v5 }
 0x16d   : > { %v2426_v52 = vpop.f32.mrb[0].mxu1 }
 0x16e   : > { %v1031_v31 = vpop.f32.mrb[1].mxu1 }
 0x16f   : > { %v2427_v37 = vpop.f32.mrb[2].mxu1 }
 0x170   : > { %v1034_v44 = vpop.f32.mrb[3].mxu1 }
 0x175   : > { %v2430_v12 = vpop.f32.mrb[4].mxu1 }
 0x176   : > { %v1047_v3 = vpop.f32.mrb[5].mxu1 }
 0x177   : > { %v2431_v11 = vpop.f32.mrb[6].mxu1 }
 0x178   : > { %v1050_v57 = vpop.f32.mrb[7].mxu1 }
 0x17d   : > { %v2434_v1 = vpop.f32.mrb[8].mxu1 }
 0x17e   : > { %v1063_v4 = vpop.f32.mrb[9].mxu1 }
 0x17f   : > { %v2435_v51 = vpop.f32.mrb[10].mxu1 }
 0x180   : > { %v1066_v17 = vpop.f32.mrb[11].mxu1 }
 0x185   : > { %v3478_v45 = vpop.f32.mrb[12].mxu1 }
 0x186   : > { %v3480_v41 = vpop.f32.mrb[13].mxu1 }
 0x187   : > { %v3482_v26 = vpop.f32.mrb[14].mxu1 }
 0x188   : > { %v3484_v61 = vpop.f32.mrb[15].mxu1 }
 0x19f   : > { %v2516_v38 = vpop.f32.mrb[0].mxu0 }
 0x1a0   : > { %v2548_v25 = vadd.f32 %v2516_v38, %v2426_v52  ;;  %v1766_v60 = vpop.f32.mrb[1].mxu0 }
 0x1a1   : > { %v2549_v46 = vadd.f32 %v1766_v60, %v1031_v31  ;;  %v2517_v22 = vpop.f32.mrb[2].mxu0 }
 0x1a2   : > { %v1854_v43 = vadd.f32 %v2548_v25, %v3486_v24  ;;  %v2550_v39 = vadd.f32 %v2517_v22, %v2427_v37  ;;  %v1769_v48 = vpop.f32.mrb[3].mxu0 }
 0x1a3   : > { %v1852_v14 = vadd.f32 %v2549_v46, %v3486_v24  ;;  %v2551_v36 = vadd.f32 %v1769_v48, %v1034_v44 }
 0x1a4   : > { %v1855_v7 = vadd.f32 %v2550_v39, %v3486_v24  ;;  %v1870_v53 = vmax.f32 %v1854_v43, 0.0 }
 0x1a5   : > { %v1853_v28 = vadd.f32 %v2551_v36, %v3486_v24  ;;  %v1868_v50 = vmax.f32 %v1852_v14, 0.0 }
 0x1a6   : > { %v1871_v33 = vmax.f32 %v1855_v7, 0.0 }
 0x1a7   : > { %v1869_v15 = vmax.f32 %v1853_v28, 0.0  ;;  %v2520_v63 = vpop.f32.mrb[4].mxu0 }
 0x1a8   : > { %v1885_v8 = vpack.c.bf16 %v1871_v33, %v1870_v53  ;;  %v2552_v19 = vadd.f32 %v2520_v63, %v2430_v12  ;;  %v1782_v55 = vpop.f32.mrb[5].mxu0 }
 0x1a9   : > { %v1884_v16 = vpack.c.bf16 %v1869_v15, %v1868_v50  ;;  %v2553_v56 = vadd.f32 %v1782_v55, %v1047_v3  ;;  %v2521_v20 = vpop.f32.mrb[6].mxu0 }
 0x1aa   : > { %v1858_v2 = vadd.f32 %v2552_v19, %v3486_v24  ;;  %v2554_v10 = vadd.f32 %v2521_v20, %v2431_v11  ;;  %v1785_v6 = vpop.f32.mrb[7].mxu0 }
 0x1ab   : > { %v1856_v40 = vadd.f32 %v2553_v56, %v3486_v24  ;;  %v2555_v0 = vadd.f32 %v1785_v6, %v1050_v57  ;;  %2532 = vmatprep.mubr.msk.bf16.mxu1 %vm345_vm1, %v1884_v16 }
 0x1ac   : > { %v1859_v18 = vadd.f32 %v2554_v10, %v3486_v24  ;;  %2533 = vmatmul.mubr.msk.bf16.vlgmr.msra.gmra.mrb[16].mxu1 %vm345_vm1, %v1885_v8  ;;  %v1874_v35 = vmax.f32 %v1858_v2, 0.0 }
 0x1ad   : > { %v1857_v5 = vadd.f32 %v2555_v0, %v3486_v24  ;;  %v1872_v59 = vmax.f32 %v1856_v40, 0.0 }
 0x1ae   : > { %v1875_v29 = vmax.f32 %v1859_v18, 0.0 }
 0x1af   : > { %v1873_v34 = vmax.f32 %v1857_v5, 0.0  ;;  %v2524_v49 = vpop.f32.mrb[8].mxu0 }
 0x1b0   : > { %v1887_v42 = vpack.c.bf16 %v1875_v29, %v1874_v35  ;;  %v2556_v23 = vadd.f32 %v2524_v49, %v2434_v1  ;;  %v1798_v27 = vpop.f32.mrb[9].mxu0 }
 0x1b1   : > { %v1886_v62 = vpack.c.bf16 %v1873_v34, %v1872_v59  ;;  %v2557_v21 = vadd.f32 %v1798_v27, %v1063_v4  ;;  %v2525_v32 = vpop.f32.mrb[10].mxu0 }
 0x1b2   : > { %v1862_v9 = vadd.f32 %v2556_v23, %v3486_v24  ;;  %v2558_v47 = vadd.f32 %v2525_v32, %v2435_v51  ;;  %v1801_v58 = vpop.f32.mrb[11].mxu0 }
 0x1b3   : > { %v1860_v13 = vadd.f32 %v2557_v21, %v3486_v24  ;;  %v2559_v54 = vadd.f32 %v1801_v58, %v1066_v17  ;;  %2536 = vmatprep.mubr.msk.bf16.mxu1 %vm345_vm1, %v1886_v62 }
 0x1b4   : > { %v1863_v30 = vadd.f32 %v2558_v47, %v3486_v24  ;;  %2537 = vmatmul.mubr.msk.bf16.gmra.mrb[20].mxu1 %vm345_vm1, %v1887_v42  ;;  %v1878_v31 = vmax.f32 %v1862_v9, 0.0 }
 0x1b5   : > { %v1861_v52 = vadd.f32 %v2559_v54, %v3486_v24  ;;  %v1876_v44 = vmax.f32 %v1860_v13, 0.0 }
 0x1b6   : > { %v1879_v37 = vmax.f32 %v1863_v30, 0.0 }
 0x1b7   : > { %v1877_v12 = vmax.f32 %v1861_v52, 0.0  ;;  %v2528_v3 = vpop.f32.mrb[12].mxu0 }
 0x1b8   : > { %v1889_v11 = vpack.c.bf16 %v1879_v37, %v1878_v31  ;;  %v2560_v57 = vadd.f32 %v2528_v3, %v3478_v45  ;;  %v1814_v1 = vpop.f32.mrb[13].mxu0 }
 0x1b9   : > { %v1888_v4 = vpack.c.bf16 %v1877_v12, %v1876_v44  ;;  %v2561_v51 = vadd.f32 %v1814_v1, %v3480_v41  ;;  %v2529_v17 = vpop.f32.mrb[14].mxu0 }
 0x1ba   : > { %v1866_v38 = vadd.f32 %v2560_v57, %v3486_v24  ;;  %v2562_v25 = vadd.f32 %v2529_v17, %v3482_v26  ;;  %v1817_v60 = vpop.f32.mrb[15].mxu0 }
 0x1bb   : > { %v1864_v46 = vadd.f32 %v2561_v51, %v3486_v24  ;;  %v2563_v22 = vadd.f32 %v1817_v60, %v3484_v61  ;;  %2540 = vmatprep.mubr.msk.bf16.mxu1 %vm345_vm1, %v1888_v4  ;;  %v2266_v61 = vld [vmem:[%s3577_s4] ss:$0 sm:$0xff] }
 0x1bc   : > { %v1867_v45 = vadd.f32 %v2562_v25, %v3486_v24  ;;  %2541 = vmatmul.mubr.msk.bf16.gmra.mrb[24].mxu1 %vm345_vm1, %v1889_v11  ;;  %v1882_v43 = vmax.f32 %v1866_v38, 0.0 }
 0x1bd   : > { %v1865_v41 = vadd.f32 %v2563_v22, %v3486_v24  ;;  %v1880_v48 = vmax.f32 %v1864_v46, 0.0 }
 0x1be   : > { %v1883_v39 = vmax.f32 %v1867_v45, 0.0 }
 0x1bf   : > { %v1881_v14 = vmax.f32 %v1865_v41, 0.0 }
 0x1c0   : > { %v1891_v26 = vpack.c.bf16 %v1883_v39, %v1882_v43 }
 0x1c1   : > { %v1890_v36 = vpack.c.bf16 %v1881_v14, %v1880_v48 }
 0x1c3   : > { %2544 = vmatprep.mubr.msk.bf16.mxu1 %vm345_vm1, %v1890_v36 }
 0x1c4   : > { %2545 = vmatmul.mubr.msk.bf16.gmra.mrb[28].mxu1 %vm345_vm1, %v1891_v26 }
 0x27f   : > { %v2534_v24 = vpop.f32.mrb[16].mxu1 }
 0x280   : > { %v1970_v7 = vadd.f32 %v2534_v24, %v2266_v61  ;;  %v1961_v28 = vpop.f32.mrb[17].mxu1 }
 0x281   : > { %v1962_v53 = vadd.f32 %v2266_v61, %v1961_v28  ;;  %v2535_v33 = vpop.f32.mrb[18].mxu1 }
 0x282   : > { %2027 = vst.msk [vmem:[%s3524_s15 + $0x10] sm:$0xff] %vm2024_vm8, %v1970_v7  ;;  %v1973_v50 = vadd.f32 %v2535_v33, %v2266_v61  ;;  %v1964_v15 = vpop.f32.mrb[19].mxu1 }
 0x283   : > { %2025 = vst.msk [vmem:[%s3524_s15] sm:$0xff] %vm2024_vm8, %v1962_v53  ;;  %v1965_v63 = vadd.f32 %v2266_v61, %v1964_v15 }
 0x284   : > { %2028 = vst.msk [vmem:[%s3524_s15 + $0x18] sm:$0xff] %vm2024_vm8, %v1973_v50 }
 0x285   : > { %2026 = vst.msk [vmem:[%s3524_s15 + $0x8] sm:$0xff] %vm2024_vm8, %v1965_v63 }
 0x287   : > { %v2538_v8 = vpop.f32.mrb[20].mxu1 }
 0x288   : > { %v1986_v19 = vadd.f32 %v2538_v8, %v2266_v61  ;;  %v1977_v55 = vpop.f32.mrb[21].mxu1 }
 0x289   : > { %v1978_v16 = vadd.f32 %v2266_v61, %v1977_v55  ;;  %v2539_v56 = vpop.f32.mrb[22].mxu1 }
 0x28a   : > { %2031 = vst.msk [vmem:[%s3524_s15 + $0x30] sm:$0xff] %vm2024_vm8, %v1986_v19  ;;  %v1989_v20 = vadd.f32 %v2539_v56, %v2266_v61  ;;  %v1980_v2 = vpop.f32.mrb[23].mxu1 }
 0x28b   : > { %2029 = vst.msk [vmem:[%s3524_s15 + $0x20] sm:$0xff] %vm2024_vm8, %v1978_v16  ;;  %v1981_v10 = vadd.f32 %v2266_v61, %v1980_v2 }
 0x28c   : > { %2032 = vst.msk [vmem:[%s3524_s15 + $0x38] sm:$0xff] %vm2024_vm8, %v1989_v20 }
 0x28d   : > { %2030 = vst.msk [vmem:[%s3524_s15 + $0x28] sm:$0xff] %vm2024_vm8, %v1981_v10 }
 0x28f   : > { %v2542_v6 = vpop.f32.mrb[24].mxu1 }
 0x290   : > { %v2002_v40 = vadd.f32 %v2542_v6, %v2266_v61  ;;  %v1993_v0 = vpop.f32.mrb[25].mxu1 }
 0x291   : > { %v1994_v18 = vadd.f32 %v2266_v61, %v1993_v0  ;;  %v2543_v5 = vpop.f32.mrb[26].mxu1 }
 0x292   : > { %2035 = vst.msk [vmem:[%s3524_s15 + $0x50] sm:$0xff] %vm2024_vm8, %v2002_v40  ;;  %v2005_v35 = vadd.f32 %v2543_v5, %v2266_v61  ;;  %v1996_v29 = vpop.f32.mrb[27].mxu1 }
 0x293   : > { %2033 = vst.msk [vmem:[%s3524_s15 + $0x40] sm:$0xff] %vm2024_vm8, %v1994_v18  ;;  %v1997_v59 = vadd.f32 %v2266_v61, %v1996_v29 }
 0x294   : > { %2036 = vst.msk [vmem:[%s3524_s15 + $0x58] sm:$0xff] %vm2024_vm8, %v2005_v35 }
 0x295   : > { %2034 = vst.msk [vmem:[%s3524_s15 + $0x48] sm:$0xff] %vm2024_vm8, %v1997_v59 }
 0x297   : > { %v2546_v34 = vpop.f32.mrb[28].mxu1 }
 0x298   : > { %v2018_v49 = vadd.f32 %v2546_v34, %v2266_v61  ;;  %v2009_v42 = vpop.f32.mrb[29].mxu1 }
 0x299   : > { %v2010_v23 = vadd.f32 %v2266_v61, %v2009_v42  ;;  %v2547_v27 = vpop.f32.mrb[30].mxu1 }
 0x29a   : > { %2039 = vst.msk [vmem:[%s3524_s15 + $0x70] sm:$0xff] %vm2024_vm8, %v2018_v49  ;;  %v2021_v62 = vadd.f32 %v2547_v27, %v2266_v61  ;;  %v2012_v21 = vpop.f32.mrb[31].mxu1 }
 0x29b   : > { %2037 = vst.msk [vmem:[%s3524_s15 + $0x60] sm:$0xff] %vm2024_vm8, %v2010_v23  ;;  %v2013_v32 = vadd.f32 %v2266_v61, %v2012_v21 }
 0x29c   : > { %2040 = vst.msk [vmem:[%s3524_s15 + $0x78] sm:$0xff] %vm2024_vm8, %v2021_v62 }
 0x29d   : > { %2038 = vst.msk [vmem:[%s3524_s15 + $0x68] sm:$0xff] %vm2024_vm8, %v2013_v32 }
 0x29e PF: > { %s16_s22 = sadd.s32 1, %s2818_s22   ;;  %s3594_s18 = smov %s2810_s20 }
 0x29f   : > { %p13_p7 = scmp.ge.s32.totalorder %s16_s22, 6   ;;  %s3595_s19 = smov %s2814_s21 }
 0x2a0   : > { %s3596_s20 = smov %s3599_s24  ;;  %s3597_s21 = smov %s3603_s25 }
 0x2a1   :  { %15 = sbr.rel (!%p13_p7) target bundleno = 3 (0x3), region = 76 }
 0x2a8   :  { %2071 = vsyncpa [#allocation3], 1 }
 0x2a9   :  { %2073 = vsyncpa [#allocation3 + $0x1], 1 }

</bundles_post_ra>
